<compile_context>
chip_gen: v7x
topology: tpu7x:2x2x1
jax: 0.10.0
libtpu: 0.0.40
codegen_flags: <defaults>
</compile_context>

<pallas_src>
import functools

import jax
import jax.numpy as jnp
from jax.experimental import pallas as pl
from jax.experimental.pallas import tpu as pltpu


def _round_up(x, m):
    return ((x + m - 1) // m) * m


def _vmem_budget_bytes():
    """Generation-aware per-kernel VMEM budget (leaves headroom for scratch)."""
    cap = 64 << 20  # conservative default = v7x per-TensorCore VMEM
    get_info = getattr(pltpu, "get_tpu_info", None)
    if get_info is not None:
        try:
            c = getattr(get_info(), "vmem_capacity_bytes", None)
            if c:
                cap = int(c)
        except Exception:
            pass
    # 3/4 of physical, capped at ~100 MiB: ~48 MiB on v7x, ~96 MiB on v5e/v6e.
    return min((cap * 3) // 4, 100 << 20)


_VMEM_BUDGET = _vmem_budget_bytes()


def _som_dist_kernel(x_ref, xsq_ref, wt_ref, wsq_ref, o_ref):
    # x_ref:   (tb, D)  batch tile (bf16 only when D is very large)
    # xsq_ref: (tb, 1)  precomputed per-sample squared norms (f32)
    # wt_ref:  (D, tk)  pre-transposed, lane-dense weight tile
    # wsq_ref: (1, tk)  precomputed per-neuron squared norms (f32)
    # o_ref:   (tb, tk) squared distances (f32)
    xw = jnp.dot(x_ref[...], wt_ref[...], preferred_element_type=jnp.float32)  # MXU
    # Clamp tiny negatives from cancellation when a sample sits on a neuron.
    o_ref[...] = jnp.maximum(xsq_ref[...] + wsq_ref[...] - 2.0 * xw, 0.0)


@functools.partial(jax.jit, static_argnames=("tb", "tk", "bf16_matmul"))
def som_forward(batch, weights, *, tb=512, tk=2048, bf16_matmul=None):
    """Squared Euclidean distances between every sample and every SOM neuron.

    batch:   (B, D) float32
    weights: (K, D) float32, K = m * n
    returns: (B, K) float32
    """
    B, D = batch.shape
    K, Dw = weights.shape
    assert D == Dw

    batch = batch.astype(jnp.float32)
    weights = weights.astype(jnp.float32)

    # Hoisted once per call.
    # TODO(synk): when weights are static across many forward calls, cache
    # wt / w_sq at parameter-update time instead of recomputing per call.
    wt = weights.T                                          # (D, K) lane-dense
    w_sq = jnp.sum(weights * weights, axis=-1)[None, :]     # (1, K)
    x_sq = jnp.sum(batch * batch, axis=-1, keepdims=True)   # (B, 1)

    # bf16 matmul only when D is big enough to leave the mem-bound regime.
    if bf16_matmul is None:
        bf16_matmul = D >= 1024
    mm_dtype = jnp.bfloat16 if bf16_matmul else jnp.float32
    esz = 2 if bf16_matmul else 4

    # ---- tile selection (all shapes are static Python ints under jit) ----
    Kp128 = _round_up(K, 128)
    Dl = _round_up(D, 128)   # lane padding of (tb, D) blocks
    Ds = _round_up(D, 8)     # sublane padding of (D, tk) blocks

    def footprint(tb_, tk_):
        # Double-buffered per-step VMEM bytes, including layout padding.
        return 2 * (esz * tb_ * Dl        # batch tile
                    + 4 * tb_ * 128       # x_sq tile
                    + esz * Ds * tk_      # weight tile
                    + 4 * 8 * tk_         # w_sq tile
                    + 4 * tb_ * tk_)      # output tile

    tb = min(tb, _round_up(B, 8))
    if footprint(tb, Kp128) <= _VMEM_BUDGET:
        # Whole (padded) weight matrix VMEM-resident: constant block index
        # across the batch sweep -> fetched from HBM once.
        tk = Kp128
    else:
        tk = min(tk, Kp128)
        while tk > 128 and footprint(tb, tk) > _VMEM_BUDGET:
            tk = max(128, (tk // 2 // 128) * 128)
        while tb > 8 and footprint(tb, tk) > _VMEM_BUDGET:
            tb = max(8, _round_up(tb // 2, 8))
        # TODO(synk): for very large D, add an 'arbitrary' D-reduction grid
        # axis with an f32 VMEM accumulator instead of only shrinking tb/tk.

    grid_b = pl.cdiv(B, tb)
    grid_k = pl.cdiv(K, tk)
    # v7x shards parallel grid axes over 2 TensorCores: keep >= 2 steps.
    if grid_b * grid_k < 2 and B > 8:
        tb = max(8, _round_up(pl.cdiv(B, 2), 8))
        grid_b = pl.cdiv(B, tb)

    # Pad only the (small) weight-side arrays so every weight block is full;
    # the (B, K) output itself is never padded nor post-sliced.
    Kp = grid_k * tk
    if Kp != K:
        wt = jnp.pad(wt, ((0, 0), (0, Kp - K)))
        w_sq = jnp.pad(w_sq, ((0, 0), (0, Kp - K)))

    x_mm = batch.astype(mm_dtype)
    wt_mm = wt.astype(mm_dtype)

    vmem_limit = int(min(_VMEM_BUDGET, max(footprint(tb, tk) + (4 << 20), 16 << 20)))

    out = pl.pallas_call(
        _som_dist_kernel,
        out_shape=jax.ShapeDtypeStruct((B, K), jnp.float32),
        grid_spec=pltpu.PrefetchScalarGridSpec(
            num_scalar_prefetch=0,
            grid=(grid_b, grid_k),
            in_specs=[
                pl.BlockSpec((tb, D), lambda i, j: (i, 0)),
                pl.BlockSpec((tb, 1), lambda i, j: (i, 0)),
                pl.BlockSpec((D, tk), lambda i, j: (0, j)),
                pl.BlockSpec((1, tk), lambda i, j: (0, j)),
            ],
            out_specs=pl.BlockSpec((tb, tk), lambda i, j: (i, j)),
        ),
        compiler_params=pltpu.CompilerParams(
            dimension_semantics=("parallel", "parallel"),
            vmem_limit_bytes=vmem_limit,
        ),
        cost_estimate=pl.CostEstimate(
            flops=2 * B * Kp * D,
            transcendentals=0,
            bytes_accessed=esz * (B * D + D * Kp) + 4 * (Kp + B + B * K),
        ),
    )(x_mm, x_sq, wt_mm, w_sq)
    return out


def init_som_weights(key, m, n, dim):
    """Deterministic stand-in for 0.0001 * torch.nn.init.xavier_normal_(rand(m*n, dim))."""
    fan_in, fan_out = dim, m * n
    std = jnp.sqrt(2.0 / (fan_in + fan_out))
    w = std * jax.random.normal(key, (m * n, dim), dtype=jnp.float32)
    return 0.0001 * w


def som_forward_reference(batch, weights):
    # Pure-JAX reference matching the PyTorch broadcast/subtract/square/sum path.
    diff = batch[:, None, :] - weights[None, :, :]
    return jnp.sum(diff * diff, axis=2)


if __name__ == "__main__":
    key = jax.random.PRNGKey(0)

    # Case 1: aligned shapes. SOM grid 8 x 16 -> K = 128 neurons, D = 32, B = 8.
    m, n, dim, B = 8, 16, 32, 8
    k_w, k_x, key = jax.random.split(key, 3)
    weights = init_som_weights(k_w, m, n, dim)               # (128, 32)
    batch = jax.random.normal(k_x, (B, dim), jnp.float32)    # (8, 32)

    dists = som_forward(batch, weights)
    jax.block_until_ready(dists)
    ref = som_forward_reference(batch, weights)
    assert dists.shape == (B, m * n)
    assert jnp.allclose(dists, ref, atol=1e-4, rtol=1e-4)

    # Case 2: unaligned shapes (partial-block / masked-store path).
    # K = 150, B = 20, D = 48.
    m2, n2, dim2, B2 = 10, 15, 48, 20
    k_w2, k_x2, key = jax.random.split(key, 3)
    weights2 = init_som_weights(k_w2, m2, n2, dim2)              # (150, 48)
    batch2 = jax.random.normal(k_x2, (B2, dim2), jnp.float32)    # (20, 48)

    dists2 = som_forward(batch2, weights2)
    jax.block_until_ready(dists2)
    ref2 = som_forward_reference(batch2, weights2)
    assert dists2.shape == (B2, m2 * n2)
    assert jnp.allclose(dists2, ref2, atol=1e-4, rtol=1e-4)

    print("KERNEL_OK")
</pallas_src>

<mosaic_0001>
module attributes {stable_mosaic.version = 11 : i64} {
  func.func @_som_dist_kernel(%arg0: i32, %arg1: i32, %arg2: memref<8x32xf32, #tpu.memory_space<vmem>>, %arg3: memref<8x1xf32, #tpu.memory_space<vmem>>, %arg4: memref<32x128xf32, #tpu.memory_space<vmem>>, %arg5: memref<1x128xf32, #tpu.memory_space<vmem>>, %arg6: memref<8x128xf32, #tpu.memory_space<vmem>>) attributes {dimension_semantics = [#tpu.dimension_semantics<parallel>, #tpu.dimension_semantics<parallel>], iteration_bounds = array<i64: 1, 1>, scalar_prefetch = 0 : i64, scratch_operands = 0 : i64, tpu.core_type = #tpu.core_type<tc>, window_params = [{transform_indices = @transform_0, window_bounds = array<i64: 8, 32>}, {transform_indices = @transform_1, window_bounds = array<i64: 8, 1>}, {transform_indices = @transform_2, window_bounds = array<i64: 32, 128>}, {transform_indices = @transform_3, window_bounds = array<i64: 1, 128>}, {transform_indices = @transform_4, window_bounds = array<i64: 8, 128>}]} {
    %c0 = arith.constant 0 : index
    %c0_0 = arith.constant 0 : index
    %0 = vector.load %arg2[%c0, %c0_0] : memref<8x32xf32, #tpu.memory_space<vmem>>, vector<8x32xf32>
    %c0_1 = arith.constant 0 : index
    %c0_2 = arith.constant 0 : index
    %1 = vector.load %arg4[%c0_1, %c0_2] : memref<32x128xf32, #tpu.memory_space<vmem>>, vector<32x128xf32>
    %cst = arith.constant dense<0.000000e+00> : vector<8x128xf32>
    %2 = tpu.matmul %0, %1, %cst {dimension_numbers = #tpu.dot_dimension_numbers<[1], [0], [0], [1], [0, 0, 1, 1], [], []>} : vector<8x32xf32>, vector<32x128xf32>, vector<8x128xf32> -> vector<8x128xf32>
    %c0_3 = arith.constant 0 : index
    %c0_4 = arith.constant 0 : index
    %3 = vector.load %arg3[%c0_3, %c0_4] : memref<8x1xf32, #tpu.memory_space<vmem>>, vector<8x1xf32>
    %c0_5 = arith.constant 0 : index
    %c0_6 = arith.constant 0 : index
    %4 = vector.load %arg5[%c0_5, %c0_6] : memref<1x128xf32, #tpu.memory_space<vmem>>, vector<1x128xf32>
    %5 = vector.broadcast %3 : vector<8x1xf32> to vector<8x128xf32>
    %6 = vector.broadcast %4 : vector<1x128xf32> to vector<8x128xf32>
    %7 = arith.addf %5, %6 : vector<8x128xf32>
    %cst_7 = arith.constant 2.000000e+00 : f32
    %8 = vector.broadcast %cst_7 : f32 to vector<8x128xf32>
    %9 = arith.mulf %8, %2 : vector<8x128xf32>
    %10 = arith.subf %7, %9 : vector<8x128xf32>
    %cst_8 = arith.constant 0.000000e+00 : f32
    %11 = vector.broadcast %cst_8 : f32 to vector<8x128xf32>
    %12 = arith.maximumf %10, %11 : vector<8x128xf32>
    %c0_9 = arith.constant 0 : index
    %c0_10 = arith.constant 0 : index
    %13 = vector.load %arg6[%c0_9, %c0_10] : memref<8x128xf32, #tpu.memory_space<vmem>>, vector<8x128xf32>
    tpu.vector_store %arg6[%c0_9, %c0_10], %12 {strides = array<i32>} : memref<8x128xf32, #tpu.memory_space<vmem>>, vector<8x128xf32>,
    return
  }
  func.func @transform_0(%arg0: i32, %arg1: i32) -> (i32, i32) {
    %c0_i32 = arith.constant 0 : i32
    %c0_i32_0 = arith.constant 0 : i32
    return %arg0, %c0_i32 : i32, i32
  }
  func.func @transform_1(%arg0: i32, %arg1: i32) -> (i32, i32) {
    %c0_i32 = arith.constant 0 : i32
    %c0_i32_0 = arith.constant 0 : i32
    return %arg0, %c0_i32 : i32, i32
  }
  func.func @transform_2(%arg0: i32, %arg1: i32) -> (i32, i32) {
    %c0_i32 = arith.constant 0 : i32
    %c0_i32_0 = arith.constant 0 : i32
    return %c0_i32, %arg1 : i32, i32
  }
  func.func @transform_3(%arg0: i32, %arg1: i32) -> (i32, i32) {
    %c0_i32 = arith.constant 0 : i32
    %c0_i32_0 = arith.constant 0 : i32
    return %c0_i32, %arg1 : i32, i32
  }
  func.func @transform_4(%arg0: i32, %arg1: i32) -> (i32, i32) {
    %c0_i32 = arith.constant 0 : i32
    return %arg0, %arg1 : i32, i32
  }
}

</mosaic_0001>

<bundles_post_ra>
// kernel: som_forward.1
= control target key start
LH: loop header
LB: loop body
LE: loop exit
PB: predicated region body
PF: predicated region fallthrough
CT: control target
= control target key end

     0   :  { %v183_v3 = vmov 0.0|0.0   ;;  %vm184_vm0 = vmmov 0   ;;  %v185_v6 = vmov 0.0   ;;  %v186_v8 = vmov 0   ;;  %s246_s0 = inlined_call_operand.vmem [shape: f32[8,32], index: 0, kind: input, shape index: {}]   ;;  %s247_s1 = inlined_call_operand.vmem [shape: f32[8,1], index: 1, kind: input, shape index: {}]   ;;  %s248_s2 = inlined_call_operand.vmem [shape: f32[32,128], index: 2, kind: input, shape index: {}]   ;;  %s249_s3 = inlined_call_operand.vmem [shape: f32[1,128], index: 3, kind: input, shape index: {}]   ;;  %s250_s4 = inlined_call_operand.hbm [shape: f32[8,128], index: 4, kind: output, shape index: {}]  }
   0x1   :  { %v19_v0 = vld [vmem:[%s248_s2] sm:$0xff]  ;;  %v20_v1 = vld [vmem:[%s248_s2 + $0x8] sm:$0xff]  ;;  %v21_v2 = vld [vmem:[%s248_s2 + $0x10] sm:$0xff]  ;;  %147 = vmatprep.subr.bf16.mxu0 %v183_v3  ;;  %144 = vmatprep.mubr.msk.f32.mxu0 %vm184_vm0, %v185_v6 }
   0x2   :  { %v148_v4 = vpack.c.bf16 %v20_v1, %v19_v0  ;;  %v22_v5 = vld [vmem:[%s248_s2 + $0x18] sm:$0xff]  ;;  %v97_v7 = vld [vmem:[%s247_s1] sm:$0xff]  ;;  %158 = vset.pattern.permute.xlu0 %v186_v8 }
   0x3   :  { %9 = vsyncpa [#allocation3], 0  ;;  %v151_v9 = vpack.c.bf16 %v22_v5, %v21_v2  ;;  %101 = vperm.xlu0 %158, %v97_v7   ;;  %v18_v10 = vld [vmem:[%s246_s0] sm:$0xff]  ;;  %vm23_vm1 = vcmask 261120   ;;  %s187_s1 = smov [#allocation2]  }
   0x4   :  { %149 = vmatpush3.bf16.msra.mxu0 %v148_v4  ;;  %v130_v11 = vld [vmem:[%s249_s3] ss:$0 sm:$0xff]  ;;  %s121_s28 = sshll.u32 %s187_s1, 4  ;;  %s122_s28 = int_to_ptr.vmem [resolvable:$true] %s121_s28 }
   0x5   :  { %150 = vmatprep.subr.bf16.mxu0 %v183_v3  ;;  %s159_s29 = scalar_lea.vmem %s122_s28, 128  ;;  %p164_p1 = scmp.lt.s32.totalorder %s122_s28, %s122_s28 }
   0x6   :  { %p160_p0 = scmp.ne.s32.totalorder %s122_s28, %s159_s29  ;;  %p165_p2 = scmp.lt.s32.totalorder %s159_s29, %s159_s29 }
   0x8   :  { %152 = vmatpush3.bf16.msra.mxu0 %v151_v9  ;;  %p166_p3 = por %p165_p2, %p164_p1 }
   0xa   :  { %p167_p4 = pnand %p166_p3, %p160_p0 }
   0xb   :  { %145 = vmatmul.mubr.msk.f32.vlgmr.msra.gmra.mrb[0].mxu0 %vm23_vm1, %v18_v10 }
  0x82   :  { %v102_v12 = vpop.permute.xlu0 %101 }
  0x83   :  { %v110_v13 = vadd.f32 %v130_v11, %v102_v12 }
  0xde   :  { %v93_v14 = vpop.f32.mrb[0].mxu0 }
  0xdf   :  { %v111_v15 = vmul.f32 2.0, %v93_v14  ;;  %v146_v16 = vpop.f32.mrb[1].mxu0 }
  0xe1   :  { %v112_v17 = vsub.f32 %v110_v13, %v111_v15 }
  0xe3   :  { %v113_v18 = vmax.f32 %v112_v17, 0.0 }
  0xe5   :  { %114 = vst [vmem:[#allocation2] sm:$0xff] %v113_v18 }
  0xe6   :  { %170 = shalt.err (!%p167_p4)
}
  0xe7   :  { %s171_s30 = scalar_lea.hbm %s250_s4, 128 }
  0xe8   :  { %p172_p5 = scmp.ne.s32.totalorder %s250_s4, %s171_s30  ;;  %p175_p6 = scmp.lt.u32.totalorder %s171_s30, %s250_s4 }
  0xea   :  { %p177_p7 = pnand %p175_p6, %p172_p5 }
  0xec   :  { %180 = shalt.err (!%p177_p7)
}
  0xed   :  { %124 = dma.vmem_to_hbm [thread:$0]  %s122_s28, 128, %s250_s4, [#allocation3]  }
  0xee   :  { %181 = dma.done.wait [#allocation3], 128  }
  0xef   :  { %182 = vsyncadd [#allocation3], 4294967168 }
  0xf0   :  { %128 = vsyncpa [#allocation3], 1 }

</bundles_post_ra>
